<compile_context>
chip_gen: v6e
topology: v6e:2x2x1
jax: 0.10.0
libtpu: 0.0.40
codegen_flags: <defaults>
</compile_context>

<pallas_src>
import jax
import jax.numpy as jnp
from jax.experimental import pallas as pl
from jax.experimental.pallas import tpu as pltpu


def se_kernel(x_ref, w1_ref, w2_ref, o_ref):
    x = x_ref[...]                                             # (bb, C) f32
    # squeeze: Linear(C -> C//r, bias=False) + ReLU ; bf16 MXU, f32 accumulate
    h = jnp.dot(x.astype(jnp.bfloat16), w1_ref[...],
                preferred_element_type=jnp.float32)
    h = jnp.maximum(h, 0.0)
    # excite: Linear(C//r -> C, bias=False) + Sigmoid (EUP)
    y = jax.nn.sigmoid(
        jnp.dot(h.astype(jnp.bfloat16), w2_ref[...],
                preferred_element_type=jnp.float32))
    # scale (excitation gate stays in f32)
    o_ref[...] = (x * y).astype(o_ref.dtype)


_TARGET_TILE_BYTES = 2 << 20      # ~2 MiB x-tile per grid step (HBM-bound)
_VMEM_BUDGET = 40 << 20           # per-step working-set budget (fits v7x 64 MiB/TC)
_VMEM_LIMIT_CAP = 48 << 20        # never ask Mosaic for more than this


def _choose_block_b(B, C, Cr, block_b):
    """Batch row-tile: multiple of 8, ~_TARGET_TILE_BYTES, VMEM-budgeted."""
    row_bytes = C * 4
    if block_b is None:
        bb = max(8, (_TARGET_TILE_BYTES // row_bytes) // 8 * 8)
    else:
        bb = max(8, (block_b // 8) * 8)
    # never larger than the (8-padded) batch
    bb = min(bb, pl.cdiv(B, 8) * 8)
    # Per step: 2 x-tile bufs + 2 out-tile bufs (f32) + ~2 tiles of compute
    # temps + single-buffered bf16 weights must fit the budget.
    w_bytes = 2 * (C * Cr) * 2
    max_bb = max(8, ((_VMEM_BUDGET - w_bytes) // (6 * row_bytes)) // 8 * 8)
    return min(bb, max_bb)


def se_forward(x, w1, w2, *, block_b=None):
    """SELayer forward.

    x  : (B, C)      float32
    w1 : (C, C//r)   fc[0].weight, pre-transposed for x @ W
    w2 : (C//r, C)   fc[2].weight, pre-transposed for h @ W
    returns (B, C) = x * sigmoid(relu(x @ w1) @ w2)
    """
    B, C = x.shape
    Cr = w1.shape[1]
    assert w1.shape == (C, Cr) and w2.shape == (Cr, C)

    bb = _choose_block_b(B, C, Cr, block_b)
    Bp = pl.cdiv(B, bb) * bb
    x_in = x if Bp == B else jnp.pad(x, ((0, Bp - B), (0, 0)))
    grid = (Bp // bb,)

    # Weights live in HBM (and VMEM) as bf16: half the DMA / resident footprint.
    w1b = w1.astype(jnp.bfloat16)
    w2b = w2.astype(jnp.bfloat16)

    tile_bytes = bb * C * 4
    w_bytes = 2 * (C * Cr) * 2
    vmem_need = 6 * tile_bytes + w_bytes
    vmem_limit = int(min(max(vmem_need + (8 << 20), 32 << 20), _VMEM_LIMIT_CAP))

    cost = pl.CostEstimate(
        flops=4 * Bp * C * Cr,            # two (Bp,C)x(C,Cr)-shaped matmuls
        transcendentals=Bp * C,           # sigmoid
        bytes_accessed=8 * Bp * C + 2 * w_bytes,
    )

    out = pl.pallas_call(
        se_kernel,
        out_shape=jax.ShapeDtypeStruct((Bp, C), x.dtype),
        grid_spec=pltpu.PrefetchScalarGridSpec(
            num_scalar_prefetch=0,
            grid=grid,
            in_specs=[
                pl.BlockSpec((bb, C), lambda i: (i, 0)),        # x row-tile
                pl.BlockSpec((C, Cr), lambda i: (0, 0),
                             pipeline_mode=pl.Buffered(1)),     # w1 resident
                pl.BlockSpec((Cr, C), lambda i: (0, 0),
                             pipeline_mode=pl.Buffered(1)),     # w2 resident
            ],
            out_specs=pl.BlockSpec((bb, C), lambda i: (i, 0)),
        ),
        compiler_params=pltpu.CompilerParams(
            # batch tiles are independent -> megacore-shardable on v7x
            dimension_semantics=("parallel",),
            vmem_limit_bytes=vmem_limit),
        cost_estimate=cost,
    )(x_in, w1b, w2b)

    return out if Bp == B else out[:B]


def make_params(channel, reduction, key):
    """Weights analogous to nn.Linear defaults (bias=False), pre-transposed."""
    cr = channel // reduction
    k1, k2 = jax.random.split(key)
    lim1 = 1.0 / jnp.sqrt(channel)
    lim2 = 1.0 / jnp.sqrt(cr)
    w1 = jax.random.uniform(k1, (channel, cr), jnp.float32, -lim1, lim1)
    w2 = jax.random.uniform(k2, (cr, channel), jnp.float32, -lim2, lim2)
    return w1, w2


def se_reference(x, w1, w2, *, bf16=True):
    """Pure-JAX reference.  bf16=True mirrors the kernel's matmul casting."""
    if bf16:
        a = x.astype(jnp.bfloat16)
        w1c, w2c = w1.astype(jnp.bfloat16), w2.astype(jnp.bfloat16)
        h = jnp.maximum(jnp.dot(a, w1c, preferred_element_type=jnp.float32), 0.0)
        y = jax.nn.sigmoid(jnp.dot(h.astype(jnp.bfloat16), w2c,
                                   preferred_element_type=jnp.float32))
    else:
        hp = jax.lax.Precision.HIGHEST
        h = jnp.maximum(jnp.dot(x, w1, precision=hp), 0.0)
        y = jax.nn.sigmoid(jnp.dot(h, w2, precision=hp))
    return x * y


if __name__ == "__main__":
    key = jax.random.PRNGKey(0)
    kx, kp, kx2, kp2 = jax.random.split(key, 4)

    # Primary small config (matches the module defaults: reduction=16).
    B, C, R = 8, 64, 16
    x = jax.random.normal(kx, (B, C), jnp.float32)
    w1, w2 = make_params(C, R, kp)

    out = jax.block_until_ready(se_forward(x, w1, w2))
    assert out.shape == (B, C), out.shape

    ref_bf16 = se_reference(x, w1, w2, bf16=True)     # mirrors kernel numerics
    ref_f32 = se_reference(x, w1, w2, bf16=False)     # exact module semantics
    err_b = float(jnp.max(jnp.abs(out - ref_bf16)))
    err_f = float(jnp.max(jnp.abs(out - ref_f32)))
    assert jnp.allclose(out, ref_bf16, atol=2e-3, rtol=2e-3), err_b
    assert jnp.allclose(out, ref_f32, atol=5e-2, rtol=5e-2), err_f

    # Secondary config: exercises batch padding + multi-step streamed grid.
    B2, C2, R2 = 300, 128, 16
    x2 = jax.random.normal(kx2, (B2, C2), jnp.float32)
    w1b, w2b = make_params(C2, R2, kp2)
    out2 = jax.block_until_ready(se_forward(x2, w1b, w2b, block_b=128))
    assert out2.shape == (B2, C2), out2.shape
    ref2 = se_reference(x2, w1b, w2b, bf16=True)
    err2 = float(jnp.max(jnp.abs(out2 - ref2)))
    assert jnp.allclose(out2, ref2, atol=2e-3, rtol=2e-3), err2

    print("KERNEL_OK")
</pallas_src>

<mosaic_0001>
module attributes {stable_mosaic.version = 11 : i64} {
  func.func @se_kernel(%arg0: i32, %arg1: memref<8x64xf32, #tpu.memory_space<vmem>>, %arg2: memref<64x4xbf16, #tpu.memory_space<vmem>>, %arg3: memref<4x64xbf16, #tpu.memory_space<vmem>>, %arg4: memref<8x64xf32, #tpu.memory_space<vmem>>) attributes {dimension_semantics = [#tpu.dimension_semantics<parallel>], iteration_bounds = array<i64: 1>, scalar_prefetch = 0 : i64, scratch_operands = 0 : i64, tpu.core_type = #tpu.core_type<tc>, window_params = [{transform_indices = @transform_0, window_bounds = array<i64: 8, 64>}, {pipeline_mode = #tpu.pipeline_mode<synchronous>, transform_indices = @transform_1, window_bounds = array<i64: 64, 4>}, {pipeline_mode = #tpu.pipeline_mode<synchronous>, transform_indices = @transform_2, window_bounds = array<i64: 4, 64>}, {transform_indices = @transform_3, window_bounds = array<i64: 8, 64>}]} {
    %c0 = arith.constant 0 : index
    %c0_0 = arith.constant 0 : index
    %0 = vector.load %arg1[%c0, %c0_0] : memref<8x64xf32, #tpu.memory_space<vmem>>, vector<8x64xf32>
    %1 = arith.truncf %0 : vector<8x64xf32> to vector<8x64xbf16>
    %c0_1 = arith.constant 0 : index
    %c0_2 = arith.constant 0 : index
    %2 = vector.load %arg2[%c0_1, %c0_2] : memref<64x4xbf16, #tpu.memory_space<vmem>>, vector<64x4xbf16>
    %cst = arith.constant dense<0.000000e+00> : vector<8x4xf32>
    %3 = tpu.matmul %1, %2, %cst {dimension_numbers = #tpu.dot_dimension_numbers<[1], [0], [0], [1], [0, 0, 1, 1], [], []>} : vector<8x64xbf16>, vector<64x4xbf16>, vector<8x4xf32> -> vector<8x4xf32>
    %cst_3 = arith.constant 0.000000e+00 : f32
    %4 = vector.broadcast %cst_3 : f32 to vector<8x4xf32>
    %5 = arith.maximumf %3, %4 : vector<8x4xf32>
    %6 = arith.truncf %5 : vector<8x4xf32> to vector<8x4xbf16>
    %c0_4 = arith.constant 0 : index
    %c0_5 = arith.constant 0 : index
    %7 = vector.load %arg3[%c0_4, %c0_5] : memref<4x64xbf16, #tpu.memory_space<vmem>>, vector<4x64xbf16>
    %cst_6 = arith.constant dense<0.000000e+00> : vector<8x64xf32>
    %8 = tpu.matmul %6, %7, %cst_6 {dimension_numbers = #tpu.dot_dimension_numbers<[1], [0], [0], [1], [0, 0, 1, 1], [], []>} : vector<8x4xbf16>, vector<4x64xbf16>, vector<8x64xf32> -> vector<8x64xf32>
    %9 = arith.negf %8 : vector<8x64xf32>
    %10 = math.exp %9 : vector<8x64xf32>
    %cst_7 = arith.constant 1.000000e+00 : f32
    %11 = vector.broadcast %cst_7 : f32 to vector<8x64xf32>
    %12 = arith.addf %11, %10 : vector<8x64xf32>
    %13 = arith.divf %11, %12 : vector<8x64xf32>
    %14 = arith.mulf %0, %13 : vector<8x64xf32>
    %c0_8 = arith.constant 0 : index
    %c0_9 = arith.constant 0 : index
    %15 = vector.load %arg4[%c0_8, %c0_9] : memref<8x64xf32, #tpu.memory_space<vmem>>, vector<8x64xf32>
    tpu.vector_store %arg4[%c0_8, %c0_9], %14 {strides = array<i32>} : memref<8x64xf32, #tpu.memory_space<vmem>>, vector<8x64xf32>,
    return
  }
  func.func @transform_0(%arg0: i32) -> (i32, i32) {
    %c0_i32 = arith.constant 0 : i32
    %c0_i32_0 = arith.constant 0 : i32
    return %arg0, %c0_i32 : i32, i32
  }
  func.func @transform_1(%arg0: i32) -> (i32, i32) {
    %c0_i32 = arith.constant 0 : i32
    %c0_i32_0 = arith.constant 0 : i32
    %c0_i32_1 = arith.constant 0 : i32
    return %c0_i32, %c0_i32_0 : i32, i32
  }
  func.func @transform_2(%arg0: i32) -> (i32, i32) {
    %c0_i32 = arith.constant 0 : i32
    %c0_i32_0 = arith.constant 0 : i32
    %c0_i32_1 = arith.constant 0 : i32
    return %c0_i32, %c0_i32_0 : i32, i32
  }
  func.func @transform_3(%arg0: i32) -> (i32, i32) {
    %c0_i32 = arith.constant 0 : i32
    %c0_i32_0 = arith.constant 0 : i32
    return %arg0, %c0_i32 : i32, i32
  }
}

</mosaic_0001>

<bundles_post_ra>
// kernel: tpu_custom_call.1
= control target key start
LH: loop header
LB: loop body
LE: loop exit
PB: predicated region body
PF: predicated region fallthrough
CT: control target
= control target key end

     0   :  { %v232_v1 = vmov 0.0   ;;  %vm233_vm0 = vmmov 0   ;;  %s278_s0 = inlined_call_operand.vmem [shape: f32[8,64], index: 0, kind: input, shape index: {}]   ;;  %s279_s1 = inlined_call_operand.vmem [shape: bf16[64,4], index: 1, kind: input, shape index: {}]   ;;  %s280_s2 = inlined_call_operand.vmem [shape: bf16[4,64], index: 2, kind: input, shape index: {}]   ;;  %s281_s3 = inlined_call_operand.hbm [shape: f32[8,64], index: 3, kind: output, shape index: {}]  }
   0x1   :  { %v202_v0 = vld [vmem:[%s279_s1 + $0x18] sm:$0xff]   ;;  %181 = vmatprep.subr.bf16.mxu0 %v232_v1  ;;  %193 = vmatprep.subr.bf16.mxu1 %v232_v1  ;;  %v203_v2 = vld [vmem:[%s279_s1 + $0x10] sm:$0xff]  }
   0x2   :  { %182 = vmatpush3.bf16.msra.mxu0 %v202_v0  ;;  %189 = vmatprep.mubr.msk.bf16.mxu0 %vm233_vm0, %v232_v1 }
   0x3   :  { %183 = vmatprep.subr.bf16.mxu0 %v232_v1  ;;  %195 = vmatprep.mubr.msk.bf16.mxu1 %vm233_vm0, %v232_v1 }
   0x4   :  { %8 = vsyncpa [#allocation3], 0  ;;  %v204_v3 = vld [vmem:[%s279_s1 + $0x8] sm:$0xff]   ;;  %v205_v4 = vld [vmem:[%s279_s1] sm:$0xff]   ;;  %vm50_vm1 = vcmask 523264   ;;  %vm101_vm2 = vcmask 1041408  }
   0x5   :  { %v16_v5 = vld [vmem:[%s278_s0] sm:$0xff]  ;;  %vm97_vm3 = vcmask 31744   ;;  %s234_s0 = smov [#allocation2]  }
   0x6   :  { %184 = vmatpush3.bf16.msra.mxu0 %v203_v2  ;;  %v17_v6 = vpack.c.bf16 %v16_v5, %v16_v5  ;;  %v96_v7 = vld [vmem:[%s280_s2] sm:$0x3]  ;;  %s159_s1 = sshll.u32 %s234_s0, 4  ;;  %s160_s1 = int_to_ptr.vmem [resolvable:$true] %s159_s1 }
   0x7   :  { %185 = vmatprep.subr.bf16.mxu0 %v232_v1  ;;  %v103_v8 = vsel %vm101_vm2, %v96_v7, 0  ;;  %s210_s2 = scalar_lea.vmem %s160_s1, 128  ;;  %p215_p1 = scmp.lt.s32.totalorder %s160_s1, %s160_s1 }
   0x8   :  { %194 = vmatpush3.bf16.msra.mxu1 %v103_v8  ;;  %p211_p0 = scmp.ne.s32.totalorder %s160_s1, %s210_s2  ;;  %p216_p2 = scmp.lt.s32.totalorder %s210_s2, %s210_s2 }
   0xa   :  { %186 = vmatpush3.bf16.msra.mxu0 %v204_v3  ;;  %p217_p3 = por %p216_p2, %p215_p1 }
   0xb   :  { %187 = vmatprep.subr.bf16.mxu0 %v232_v1 }
   0xc   :  { %p218_p4 = pnand %p217_p3, %p211_p0 }
   0xe   :  { %188 = vmatpush3.bf16.msra.mxu0 %v205_v4 }
  0x11   :  { %190 = vmatmul.mubr.msk.bf16.vlgmr.msra.gmra.mxu0 %vm50_vm1, %v17_v6 }
  0xd1   :  { %v88_v9 = vpop.f32.mrf.mxu0 }
  0xd2   :  { %v94_v10 = vmax.f32 %v88_v9, 0.0 }
  0xd3   :  { %v191_v11 = vpop.f32.mrf.mxu0 }
  0xd4   :  { %v95_v12 = vpack.c.bf16 %v94_v10, %v94_v10 }
  0xd5   :  { %v91_v13 = vpop.f32.mrf.mxu0 }
  0xd6   :  { %196 = vmatmul.mubr.msk.bf16.vlgmr.msra.gmra.mxu1 %vm97_vm3, %v95_v12 }
  0xd7   :  { %v192_v14 = vpop.f32.mrf.mxu0 }
 0x196   :  { %v139_v15 = vpop.f32.mrf.mxu1 }
 0x197   :  { %v173_v16 = vmul.f32 -1.442695, %v139_v15 }
 0x198   :  { %v197_v17 = vpop.f32.mrf.mxu1 }
 0x199   :  { %206 = vpow2.f32 %v173_v16 }
 0x19a   :  { %v142_v18 = vpop.f32.mrf.mxu1 }
 0x19c   :  { %v198_v19 = vpop.f32.mrf.mxu1 }
 0x1a6   :  { %v207_v20 = vpop.eup %206 }
 0x1a7   :  { %v148_v21 = vadd.f32 1.0, %v207_v20 }
 0x1a9   :  { %208 = vrcp.f32 %v148_v21 }
 0x1b6   :  { %v209_v22 = vpop.eup %208 }
 0x1b7   :  { %v151_v23 = vmul.f32 %v209_v22, %v16_v5 }
 0x1b9   :  { %152 = vst.msk [vmem:[#allocation2] sm:$0xff] %vm50_vm1, %v151_v23 }
 0x1ba   :  { %221 = shalt.err (!%p218_p4)
}
 0x1bb   :  { %162 = dma.vmem_to_hbm [thread:$0]  %s160_s1, 128, %s281_s3, [#allocation3]  }
 0x1bc   :  { %230 = dma.done.wait [#allocation3], 128  }
 0x1bd   :  { %231 = vsyncadd [#allocation3], 4294967168 }
 0x1be   :  { %166 = vsyncpa [#allocation3], 1 }

</bundles_post_ra>
